<compile_context>
chip_gen: v6e
topology: v6e:2x2x1
jax: 0.10.0
libtpu: 0.0.40
codegen_flags: <defaults>
</compile_context>

<pallas_src>
import jax
import jax.numpy as jnp
from jax import lax
from jax.experimental import pallas as pl
from jax.experimental.pallas import tpu as pltpu

LN_EPS = 1e-5
INV_SQRT2 = 0.7071067811865476
_MIB = 1024 * 1024


def block_kernel(x_ref, gamma_ref, w1_ref, b1_ref, w2_ref, b2_ref, o_ref, xn_ref):
    j = pl.program_id(1)

    @pl.when(j == 0)
    def _():
        # LayerNorm (no bias) computed once per token tile, cached in bf16 scratch.
        x = x_ref[...].astype(jnp.float32)                     # [TM, H]
        mean = jnp.mean(x, axis=-1, keepdims=True)
        c = x - mean
        var = jnp.mean(c * c, axis=-1, keepdims=True)          # biased variance
        xn = c * lax.rsqrt(var + LN_EPS) * gamma_ref[...]      # [1, H] broadcast
        xn_ref[...] = xn.astype(jnp.bfloat16)
        o_ref[...] = jnp.zeros_like(o_ref)                     # f32 output tile is the accumulator

    # fc1 chunk: [TM, H] @ [H, TN]  (bf16 inputs, f32 accumulation on the MXU)
    h = jnp.dot(xn_ref[...], w1_ref[...], preferred_element_type=jnp.float32)
    h = h + b1_ref[...]                                        # [1, TN] broadcast
    # exact (erf-based) GELU in f32 — matches torch.nn.GELU() default
    h = 0.5 * h * (1.0 + lax.erf(h * INV_SQRT2))
    # partial fc2: [TM, TN] @ [TN, H] accumulated directly into the resident output tile
    o_ref[...] += jnp.dot(h.astype(jnp.bfloat16), w2_ref[...],
                          preferred_element_type=jnp.float32)

    @pl.when(j == pl.num_programs(1) - 1)
    def _():
        o_ref[...] = o_ref[...] + b2_ref[...]                  # [1, H] broadcast


def _round_up(x, m):
    return ((x + m - 1) // m) * m


def _physical_vmem_bytes():
    """Generation-aware physical VMEM (per TensorCore). Conservative 64 MiB default."""
    try:
        info = pltpu.get_tpu_info()
        v = getattr(info, "vmem_capacity_bytes", None)
        if v:
            return int(v)
    except Exception:
        pass
    try:
        kind = jax.devices()[0].device_kind.lower()
        if "v5" in kind or "v6" in kind:
            return 128 * _MIB
        if "v7" in kind:
            return 64 * _MIB
    except Exception:
        pass
    return 64 * _MIB


def _vmem_estimate(tm, tn, H):
    """Double-buffered block buffers + scratch + in-kernel [TM,TN] intermediate."""
    return (2 * tm * H * 4          # x blocks (f32)
            + 2 * tm * H * 4        # out blocks (f32, doubles as accumulator)
            + 2 * H * tn * 2        # w1 blocks (bf16)
            + 2 * tn * H * 2        # w2 blocks (bf16)
            + 2 * 8 * tn * 4        # b1 blocks (sublane-padded)
            + 4 * 8 * H * 4         # gamma + b2
            + tm * H * 2            # xn scratch (bf16)
            + tm * tn * 6)          # fc1 intermediate (f32 + bf16 cast)


def _choose_tiles(T, H, H4, budget):
    """Maximize tm first (weight-stream intensity = tm flop/B), then tn, within budget."""
    t_cap = _round_up(max(T, 1), 16)
    tm_cands = [t for t in (1024, 896, 768, 640, 512, 384, 256, 192, 128, 96, 64, 48, 32, 16)
                if t <= t_cap]
    if not tm_cands:
        tm_cands = [t_cap]
    tn_cands = [t for t in (2048, 1024, 512, 256, 128) if t <= H4 and H4 % t == 0]
    if not tn_cands:
        tn_cands = [H4]        # ragged 4H: single chunk
    for tm in tm_cands:
        for tn in tn_cands:
            if _vmem_estimate(tm, tn, H) <= budget:
                return tm, tn
    return tm_cands[-1], tn_cands[-1]


def block_forward(x, gamma, w1, b1, w2, b2):
    """x: [B, S, H] f32. gamma:[1,H], w1:[H,4H], b1:[1,4H], w2:[4H,H], b2:[1,H]."""
    B, S, H = x.shape
    H4 = 4 * H
    T = B * S
    x2 = x.reshape(T, H)

    phys = _physical_vmem_bytes()
    budget = phys - 12 * _MIB            # headroom for Mosaic internal scratch

    tm, tn = _choose_tiles(T, H, H4, budget)
    # keep >=2 token tiles when there is enough work so v7x's two TensorCores both run
    if T > 256 and _round_up(T, tm) // tm < 2:
        tm = max(16, _round_up((T + 1) // 2, 16))

    T_pad = _round_up(T, tm)
    if T_pad != T:
        x2 = jnp.pad(x2, ((0, T_pad - T), (0, 0)))   # padded rows are discarded at the end

    n_i = T_pad // tm
    n_j = H4 // tn if H4 % tn == 0 else 1
    if n_j == 1:
        tn = H4

    # bf16 weights (halve streamed bytes). w1 pre-tiled to [n_j, H, tn] so every streamed
    # block is one contiguous HBM slab instead of a strided column slice of [H, 4H].
    # (On v7x, fp8-e4m3 weights would halve streamed bytes again; kept bf16 for accuracy.)
    w1t = w1.astype(jnp.bfloat16).reshape(H, n_j, tn).transpose(1, 0, 2)
    w2b = w2.astype(jnp.bfloat16)

    est = _vmem_estimate(tm, tn, H)
    vmem_limit = int(max(32 * _MIB, min(phys - 4 * _MIB, est + 16 * _MIB)))

    flops = 4 * T_pad * H * H4                              # two matmuls, 2*M*N*K each
    bytes_accessed = (T_pad * H * 4 * 2                     # x in + y out (f32)
                      + n_i * (H * H4 + H4 * H) * 2         # bf16 weights, re-streamed per token tile
                      + (H4 + 3 * H) * 4)                   # biases + gamma

    out = pl.pallas_call(
        block_kernel,
        out_shape=jax.ShapeDtypeStruct((T_pad, H), jnp.float32),
        grid_spec=pltpu.PrefetchScalarGridSpec(
            num_scalar_prefetch=0,
            grid=(n_i, n_j),
            in_specs=[
                pl.BlockSpec((tm, H), lambda i, j: (i, 0)),           # x (resident across j)
                pl.BlockSpec((1, H), lambda i, j: (0, 0)),            # gamma (pinned)
                pl.BlockSpec((None, H, tn), lambda i, j: (j, 0, 0)),  # w1 block (contiguous slab)
                pl.BlockSpec((1, tn), lambda i, j: (0, j)),           # b1 chunk
                pl.BlockSpec((tn, H), lambda i, j: (j, 0)),           # w2 block (row slab)
                pl.BlockSpec((1, H), lambda i, j: (0, 0)),            # b2 (pinned)
            ],
            out_specs=pl.BlockSpec((tm, H), lambda i, j: (i, 0)),     # output = accumulator
            scratch_shapes=[pltpu.VMEM((tm, H), jnp.bfloat16)],       # cached LayerNorm output
        ),
        compiler_params=pltpu.CompilerParams(
            dimension_semantics=("parallel", "arbitrary"),
            vmem_limit_bytes=vmem_limit,
        ),
        cost_estimate=pl.CostEstimate(flops=int(flops),
                                      transcendentals=int(T_pad * H4),
                                      bytes_accessed=int(bytes_accessed)),
    )(x2, gamma, w1t, b1, w2b, b2)

    return out[:T].reshape(B, S, H)


def make_params(hidden, key):
    """Deterministic parameter init mirroring the module's shapes.

    nn.LayerNorm(hidden, bias=False) -> weight [hidden] (ones at init)
    fc1: nn.Linear(hidden, 4*hidden) ; fc2: nn.Linear(4*hidden, hidden)
    Weights are stored [in, out] for the kernel (so it computes x @ W + b).
    """
    k1, k2, k3, k4 = jax.random.split(key, 4)
    H = hidden
    H4 = 4 * hidden
    gamma = jnp.ones((1, H), jnp.float32)
    bound1 = 1.0 / jnp.sqrt(H)
    bound2 = 1.0 / jnp.sqrt(H4)
    w1 = jax.random.uniform(k1, (H, H4), jnp.float32, -bound1, bound1)   # [in, out]
    b1 = jax.random.uniform(k2, (1, H4), jnp.float32, -bound1, bound1)
    w2 = jax.random.uniform(k3, (H4, H), jnp.float32, -bound2, bound2)   # [in, out]
    b2 = jax.random.uniform(k4, (1, H), jnp.float32, -bound2, bound2)
    return gamma, w1, b1, w2, b2


def reference_forward(x, gamma, w1, b1, w2, b2):
    """Pure-JAX reference mirroring the kernel's precision (bf16 matmuls, f32 rest)."""
    B, S, H = x.shape
    xf = x.reshape(B * S, H).astype(jnp.float32)
    mean = jnp.mean(xf, axis=-1, keepdims=True)
    var = jnp.mean((xf - mean) ** 2, axis=-1, keepdims=True)
    xn = (xf - mean) * lax.rsqrt(var + LN_EPS) * gamma[0]
    h = jnp.dot(xn.astype(jnp.bfloat16), w1.astype(jnp.bfloat16),
                preferred_element_type=jnp.float32) + b1[0]
    h = 0.5 * h * (1.0 + lax.erf(h * INV_SQRT2))
    y = jnp.dot(h.astype(jnp.bfloat16), w2.astype(jnp.bfloat16),
                preferred_element_type=jnp.float32) + b2[0]
    return y.reshape(B, S, H)


if __name__ == "__main__":
    key = jax.random.PRNGKey(0)
    kx, kp = jax.random.split(key)

    B, S, H = 2, 8, 32                      # batch=2, seq=8, hidden=32
    x = jax.random.normal(kx, (B, S, H), jnp.float32)
    gamma, w1, b1, w2, b2 = make_params(H, kp)

    y = block_forward(x, gamma, w1, b1, w2, b2)
    y = jax.block_until_ready(y)

    y_ref = reference_forward(x, gamma, w1, b1, w2, b2)
    assert y.shape == (B, S, H)
    assert jnp.allclose(y, y_ref, atol=1e-3, rtol=1e-3), "mismatch vs JAX reference"

    print("KERNEL_OK")
</pallas_src>

<mosaic_0001>
module attributes {stable_mosaic.version = 11 : i64} {
  func.func @block_kernel(%arg0: i32, %arg1: i32, %arg2: memref<16x32xf32, #tpu.memory_space<vmem>>, %arg3: memref<1x32xf32, #tpu.memory_space<vmem>>, %arg4: memref<1x32x128xbf16, #tpu.memory_space<vmem>>, %arg5: memref<1x128xf32, #tpu.memory_space<vmem>>, %arg6: memref<128x32xbf16, #tpu.memory_space<vmem>>, %arg7: memref<1x32xf32, #tpu.memory_space<vmem>>, %arg8: memref<16x32xf32, #tpu.memory_space<vmem>>, %arg9: memref<16x32xbf16, #tpu.memory_space<vmem>>) attributes {dimension_semantics = [#tpu.dimension_semantics<parallel>, #tpu.dimension_semantics<arbitrary>], iteration_bounds = array<i64: 1, 1>, scalar_prefetch = 0 : i64, scratch_operands = 1 : i64, tpu.core_type = #tpu.core_type<tc>, window_params = [{transform_indices = @transform_0, window_bounds = array<i64: 16, 32>}, {pipeline_mode = #tpu.pipeline_mode<synchronous>, transform_indices = @transform_1, window_bounds = array<i64: 1, 32>}, {transform_indices = @transform_2, window_bounds = array<i64: 1, 32, 128>}, {transform_indices = @transform_3, window_bounds = array<i64: 1, 128>}, {transform_indices = @transform_4, window_bounds = array<i64: 128, 32>}, {pipeline_mode = #tpu.pipeline_mode<synchronous>, transform_indices = @transform_5, window_bounds = array<i64: 1, 32>}, {transform_indices = @transform_6, window_bounds = array<i64: 16, 32>}]} {
    %c0_i32 = arith.constant 0 : i32
    %0 = arith.cmpi eq, %arg1, %c0_i32 : i32
    %1 = arith.extui %0 : i1 to i32
    %c0_i32_0 = arith.constant 0 : i32
    %2 = arith.cmpi ne, %1, %c0_i32_0 : i32
    scf.if %2 {
      %c0_19 = arith.constant 0 : index
      %c0_20 = arith.constant 0 : index
      %27 = vector.load %arg2[%c0_19, %c0_20] : memref<16x32xf32, #tpu.memory_space<vmem>>, vector<16x32xf32>
      %cst_21 = arith.constant dense<0.000000e+00> : vector<16xf32>
      %28 = vector.multi_reduction <add>, %27, %cst_21 [1] : vector<16x32xf32> to vector<16xf32>
      %29 = vector.shape_cast %28 : vector<16xf32> to vector<16x1xf32>
      %cst_22 = arith.constant 3.200000e+01 : f32
      %30 = vector.broadcast %cst_22 : f32 to vector<16x1xf32>
      %31 = arith.divf %29, %30 : vector<16x1xf32>
      %32 = vector.broadcast %31 : vector<16x1xf32> to vector<16x32xf32>
      %33 = arith.subf %27, %32 : vector<16x32xf32>
      %34 = arith.mulf %33, %33 : vector<16x32xf32>
      %cst_23 = arith.constant dense<0.000000e+00> : vector<16xf32>
      %35 = vector.multi_reduction <add>, %34, %cst_23 [1] : vector<16x32xf32> to vector<16xf32>
      %36 = vector.shape_cast %35 : vector<16xf32> to vector<16x1xf32>
      %cst_24 = arith.constant 3.200000e+01 : f32
      %37 = vector.broadcast %cst_24 : f32 to vector<16x1xf32>
      %38 = arith.divf %36, %37 : vector<16x1xf32>
      %cst_25 = arith.constant 9.99999974E-6 : f32
      %39 = vector.broadcast %cst_25 : f32 to vector<16x1xf32>
      %40 = arith.addf %38, %39 : vector<16x1xf32>
      %41 = math.rsqrt %40 : vector<16x1xf32>
      %42 = vector.broadcast %41 : vector<16x1xf32> to vector<16x32xf32>
      %43 = arith.mulf %33, %42 : vector<16x32xf32>
      %c0_26 = arith.constant 0 : index
      %c0_27 = arith.constant 0 : index
      %44 = vector.load %arg3[%c0_26, %c0_27] : memref<1x32xf32, #tpu.memory_space<vmem>>, vector<1x32xf32>
      %45 = vector.broadcast %44 : vector<1x32xf32> to vector<16x32xf32>
      %46 = arith.mulf %43, %45 : vector<16x32xf32>
      %47 = arith.truncf %46 : vector<16x32xf32> to vector<16x32xbf16>
      %c0_28 = arith.constant 0 : index
      %c0_29 = arith.constant 0 : index
      %48 = vector.load %arg9[%c0_28, %c0_29] : memref<16x32xbf16, #tpu.memory_space<vmem>>, vector<16x32xbf16>
      tpu.vector_store %arg9[%c0_28, %c0_29], %47 {strides = array<i32>} : memref<16x32xbf16, #tpu.memory_space<vmem>>, vector<16x32xbf16>,
      %cst_30 = arith.constant 0.000000e+00 : f32
      %49 = vector.broadcast %cst_30 : f32 to vector<16x32xf32>
      %c0_31 = arith.constant 0 : index
      %c0_32 = arith.constant 0 : index
      %50 = vector.load %arg8[%c0_31, %c0_32] : memref<16x32xf32, #tpu.memory_space<vmem>>, vector<16x32xf32>
      tpu.vector_store %arg8[%c0_31, %c0_32], %49 {strides = array<i32>} : memref<16x32xf32, #tpu.memory_space<vmem>>, vector<16x32xf32>,
    } else {
    }
    %c0 = arith.constant 0 : index
    %c0_1 = arith.constant 0 : index
    %3 = vector.load %arg9[%c0, %c0_1] : memref<16x32xbf16, #tpu.memory_space<vmem>>, vector<16x32xbf16>
    %c0_2 = arith.constant 0 : index
    %c0_3 = arith.constant 0 : index
    %c0_4 = arith.constant 0 : index
    %4 = vector.load %arg4[%c0_2, %c0_3, %c0_4] : memref<1x32x128xbf16, #tpu.memory_space<vmem>>, vector<1x32x128xbf16>
    %5 = vector.shape_cast %4 : vector<1x32x128xbf16> to vector<32x128xbf16>
    %cst = arith.constant dense<0.000000e+00> : vector<16x128xf32>
    %6 = tpu.matmul %3, %5, %cst {dimension_numbers = #tpu.dot_dimension_numbers<[1], [0], [0], [1], [0, 0, 1, 1], [], []>} : vector<16x32xbf16>, vector<32x128xbf16>, vector<16x128xf32> -> vector<16x128xf32>
    %c0_5 = arith.constant 0 : index
    %c0_6 = arith.constant 0 : index
    %7 = vector.load %arg5[%c0_5, %c0_6] : memref<1x128xf32, #tpu.memory_space<vmem>>, vector<1x128xf32>
    %8 = vector.broadcast %7 : vector<1x128xf32> to vector<16x128xf32>
    %9 = arith.addf %6, %8 : vector<16x128xf32>
    %cst_7 = arith.constant 5.000000e-01 : f32
    %10 = vector.broadcast %cst_7 : f32 to vector<16x128xf32>
    %11 = arith.mulf %10, %9 : vector<16x128xf32>
    %cst_8 = arith.constant 0.707106769 : f32
    %12 = vector.broadcast %cst_8 : f32 to vector<16x128xf32>
    %13 = arith.mulf %9, %12 : vector<16x128xf32>
    %14 = math.erf %13 : vector<16x128xf32>
    %cst_9 = arith.constant 1.000000e+00 : f32
    %15 = vector.broadcast %cst_9 : f32 to vector<16x128xf32>
    %16 = arith.addf %15, %14 : vector<16x128xf32>
    %17 = arith.mulf %11, %16 : vector<16x128xf32>
    %c0_10 = arith.constant 0 : index
    %c0_11 = arith.constant 0 : index
    %18 = vector.load %arg8[%c0_10, %c0_11] : memref<16x32xf32, #tpu.memory_space<vmem>>, vector<16x32xf32>
    %19 = arith.truncf %17 : vector<16x128xf32> to vector<16x128xbf16>
    %c0_12 = arith.constant 0 : index
    %c0_13 = arith.constant 0 : index
    %20 = vector.load %arg6[%c0_12, %c0_13] : memref<128x32xbf16, #tpu.memory_space<vmem>>, vector<128x32xbf16>
    %cst_14 = arith.constant dense<0.000000e+00> : vector<16x32xf32>
    %21 = tpu.matmul %19, %20, %cst_14 {dimension_numbers = #tpu.dot_dimension_numbers<[1], [0], [0], [1], [0, 0, 1, 1], [], []>} : vector<16x128xbf16>, vector<128x32xbf16>, vector<16x32xf32> -> vector<16x32xf32>
    %22 = arith.addf %18, %21 : vector<16x32xf32>
    %c0_15 = arith.constant 0 : index
    %c0_16 = arith.constant 0 : index
    %23 = vector.load %arg8[%c0_15, %c0_16] : memref<16x32xf32, #tpu.memory_space<vmem>>, vector<16x32xf32>
    tpu.vector_store %arg8[%c0_15, %c0_16], %22 {strides = array<i32>} : memref<16x32xf32, #tpu.memory_space<vmem>>, vector<16x32xf32>,
    %c0_i32_17 = arith.constant 0 : i32
    %24 = arith.cmpi eq, %arg1, %c0_i32_17 : i32
    %25 = arith.extui %24 : i1 to i32
    %c0_i32_18 = arith.constant 0 : i32
    %26 = arith.cmpi ne, %25, %c0_i32_18 : i32
    scf.if %26 {
      %c0_19 = arith.constant 0 : index
      %c0_20 = arith.constant 0 : index
      %27 = vector.load %arg8[%c0_19, %c0_20] : memref<16x32xf32, #tpu.memory_space<vmem>>, vector<16x32xf32>
      %c0_21 = arith.constant 0 : index
      %c0_22 = arith.constant 0 : index
      %28 = vector.load %arg7[%c0_21, %c0_22] : memref<1x32xf32, #tpu.memory_space<vmem>>, vector<1x32xf32>
      %29 = vector.broadcast %28 : vector<1x32xf32> to vector<16x32xf32>
      %30 = arith.addf %27, %29 : vector<16x32xf32>
      %c0_23 = arith.constant 0 : index
      %c0_24 = arith.constant 0 : index
      %31 = vector.load %arg8[%c0_23, %c0_24] : memref<16x32xf32, #tpu.memory_space<vmem>>, vector<16x32xf32>
      tpu.vector_store %arg8[%c0_23, %c0_24], %30 {strides = array<i32>} : memref<16x32xf32, #tpu.memory_space<vmem>>, vector<16x32xf32>,
    } else {
    }
    return
  }
  func.func @transform_0(%arg0: i32, %arg1: i32) -> (i32, i32) {
    %c0_i32 = arith.constant 0 : i32
    %c0_i32_0 = arith.constant 0 : i32
    return %arg0, %c0_i32 : i32, i32
  }
  func.func @transform_1(%arg0: i32, %arg1: i32) -> (i32, i32) {
    %c0_i32 = arith.constant 0 : i32
    %c0_i32_0 = arith.constant 0 : i32
    %c0_i32_1 = arith.constant 0 : i32
    return %c0_i32, %c0_i32_0 : i32, i32
  }
  func.func @transform_2(%arg0: i32, %arg1: i32) -> (i32, i32, i32) {
    %c0_i32 = arith.constant 0 : i32
    %c0_i32_0 = arith.constant 0 : i32
    %c0_i32_1 = arith.constant 0 : i32
    return %arg1, %c0_i32, %c0_i32_0 : i32, i32, i32
  }
  func.func @transform_3(%arg0: i32, %arg1: i32) -> (i32, i32) {
    %c0_i32 = arith.constant 0 : i32
    %c0_i32_0 = arith.constant 0 : i32
    return %c0_i32, %arg1 : i32, i32
  }
  func.func @transform_4(%arg0: i32, %arg1: i32) -> (i32, i32) {
    %c0_i32 = arith.constant 0 : i32
    %c0_i32_0 = arith.constant 0 : i32
    return %arg1, %c0_i32 : i32, i32
  }
  func.func @transform_5(%arg0: i32, %arg1: i32) -> (i32, i32) {
    %c0_i32 = arith.constant 0 : i32
    %c0_i32_0 = arith.constant 0 : i32
    %c0_i32_1 = arith.constant 0 : i32
    return %c0_i32, %c0_i32_0 : i32, i32
  }
  func.func @transform_6(%arg0: i32, %arg1: i32) -> (i32, i32) {
    %c0_i32 = arith.constant 0 : i32
    %c0_i32_0 = arith.constant 0 : i32
    return %arg0, %c0_i32 : i32, i32
  }
}

</mosaic_0001>

<bundles_post_ra>
// kernel: tpu_custom_call.1
= control target key start
LH: loop header
LB: loop body
LE: loop exit
PB: predicated region body
PF: predicated region fallthrough
CT: control target
= control target key end

     0   :  { %vm31_vm0 = vcmask 261120   ;;  %s514_s0 = inlined_call_operand.vmem [shape: f32[16,32], index: 0, kind: input, shape index: {}]   ;;  %s515_s1 = inlined_call_operand.vmem [shape: f32[1,32], index: 1, kind: input, shape index: {}]   ;;  %s516_s2 = inlined_call_operand.vmem [shape: bf16[1,32,128], index: 2, kind: input, shape index: {}]   ;;  %s517_s3 = inlined_call_operand.vmem [shape: f32[1,128], index: 3, kind: input, shape index: {}]   ;;  %s518_s4 = inlined_call_operand.vmem [shape: bf16[128,32], index: 4, kind: input, shape index: {}]   ;;  %s519_s5 = inlined_call_operand.vmem [shape: f32[1,32], index: 5, kind: input, shape index: {}]   ;;  %s520_s6 = inlined_call_operand.hbm [shape: f32[16,32], index: 6, kind: output, shape index: {}]  }
   0x1   :  { %v29_v0 = vld [vmem:[%s514_s0] sm:$0xff]  ;;  %v30_v1 = vld [vmem:[%s514_s0 + $0x8] sm:$0xff] }
   0x2   :  { %v32_v2 = vsel %vm31_vm0, %v29_v0, 0.0  ;;  %v35_v3 = vsel %vm31_vm0, %v30_v1, 0.0 }
   0x3   :  { %33 = vadd.xlane.f32.xlu0 %v32_v2 }
   0x7   :  { %36 = vadd.xlane.f32.xlu0 %v35_v3 }
   0x8   :  { %11 = vsyncpa [#allocation4], 0  ;;  %v374_v14 = vld [vmem:[%s516_s2 + $0x8] sm:$0xff]   ;;  %v415_v15 = vmov 0.0   ;;  %vm416_vm1 = vmmov 0   ;;  %v375_v16 = vld [vmem:[%s516_s2] sm:$0xff]  }
   0x9   :  { %341 = vmatprep.subr.bf16.mxu0 %v415_v15  ;;  %79 = vst.msk [vmem:[#allocation3] sm:$0xff] %vm31_vm0, %v415_v15  ;;  %80 = vst.msk [vmem:[#allocation3 + $0x8] sm:$0xff] %vm31_vm0, %v415_v15  ;;  %345 = vmatprep.mubr.msk.bf16.mxu0 %vm416_vm1, %v415_v15  ;;  %v377_v17 = vld [vmem:[%s518_s4 + $0x38] sm:$0xff]   ;;  %v310_v25 = vld [vmem:[%s515_s1] ss:$0 sm:$0xff]  ;;  %vm76_vm2 = vcmask 257024  }
   0xa   :  { %342 = vmatpush3.bf16.msra.mxu0 %v374_v14  ;;  %349 = vmatprep.subr.bf16.mxu1 %v415_v15  ;;  %v378_v34 = vld [vmem:[%s518_s4 + $0x30] sm:$0xff]   ;;  %v379_v35 = vld [vmem:[%s518_s4 + $0x28] sm:$0xff]   ;;  %v380_v36 = vld [vmem:[%s518_s4 + $0x20] sm:$0xff]   ;;  %s417_s22 = smov [#allocation3]  }
   0xb   :  { %343 = vmatprep.subr.bf16.mxu0 %v415_v15  ;;  %365 = vmatprep.mubr.msk.bf16.mxu1 %vm416_vm1, %v415_v15  ;;  %v381_v37 = vld [vmem:[%s518_s4 + $0x18] sm:$0xff]   ;;  %v382_v38 = vld [vmem:[%s518_s4 + $0x10] sm:$0xff]   ;;  %v383_v39 = vld [vmem:[%s518_s4 + $0x8] sm:$0xff]   ;;  %s299_s23 = sshll.u32 %s417_s22, 4  ;;  %s300_s23 = int_to_ptr.vmem [resolvable:$true] %s299_s23 }
   0xc   :  { %350 = vmatpush3.bf16.msra.mxu1 %v377_v17  ;;  %v384_v40 = vld [vmem:[%s518_s4] sm:$0xff]   ;;  %s393_s24 = scalar_lea.vmem %s300_s23, 256  ;;  %p398_p1 = scmp.lt.s32.totalorder %s300_s23, %s300_s23 }
   0xd   :  { %351 = vmatprep.subr.bf16.mxu1 %v415_v15  ;;  %v313_v41 = vld [vmem:[%s517_s3] ss:$0 sm:$0xff]  ;;  %p394_p0 = scmp.ne.s32.totalorder %s300_s23, %s393_s24  ;;  %p399_p2 = scmp.lt.s32.totalorder %s393_s24, %s393_s24 }
   0xe   :  { %344 = vmatpush3.bf16.msra.mxu0 %v375_v16  ;;  %v326_v3 = vld [vmem:[%s519_s5] ss:$0 sm:$0xff] }
   0xf   :  { %p400_p3 = por %p399_p2, %p398_p1 }
  0x10   :  { %352 = vmatpush3.bf16.msra.mxu1 %v378_v34  ;;  %v166_v59 = vld [vmem:[#allocation3] sm:$0xff]  ;;  %v167_v63 = vld [vmem:[#allocation3 + $0x8] sm:$0xff] }
  0x11   :  { %353 = vmatprep.subr.bf16.mxu1 %v415_v15  ;;  %p401_p4 = pnand %p400_p3, %p394_p0 }
  0x14   :  { %354 = vmatpush3.bf16.msra.mxu1 %v379_v35 }
  0x15   :  { %355 = vmatprep.subr.bf16.mxu1 %v415_v15 }
  0x18   :  { %356 = vmatpush3.bf16.msra.mxu1 %v380_v36 }
  0x19   :  { %357 = vmatprep.subr.bf16.mxu1 %v415_v15 }
  0x1c   :  { %358 = vmatpush3.bf16.msra.mxu1 %v381_v37 }
  0x1d   :  { %359 = vmatprep.subr.bf16.mxu1 %v415_v15 }
  0x20   :  { %360 = vmatpush3.bf16.msra.mxu1 %v382_v38 }
  0x21   :  { %361 = vmatprep.subr.bf16.mxu1 %v415_v15 }
  0x24   :  { %362 = vmatpush3.bf16.msra.mxu1 %v383_v39 }
  0x25   :  { %363 = vmatprep.subr.bf16.mxu1 %v415_v15 }
  0x28   :  { %364 = vmatpush3.bf16.msra.mxu1 %v384_v40 }
  0x8c   :  { %v34_v4 = vpop.xlane.xlu0 %33 }
  0x8d   :  { %v39_v5 = vmul.f32 0.03125, %v34_v4 }
  0x8f   :  { %v41_v6 = vsub.f32 %v29_v0, %v39_v5 }
  0x90   :  { %v37_v7 = vpop.xlane.xlu0 %36 }
  0x91   :  { %v40_v8 = vmul.f32 0.03125, %v37_v7  ;;  %v43_v9 = vmul.f32 %v41_v6, %v41_v6 }
  0x93   :  { %v42_v10 = vsub.f32 %v30_v1, %v40_v8  ;;  %v45_v11 = vsel %vm31_vm0, %v43_v9, 0.0 }
  0x94   :  { %46 = vadd.xlane.f32.xlu1 %v45_v11 }
  0x95   :  { %v44_v12 = vmul.f32 %v42_v10, %v42_v10 }
  0x97   :  { %v48_v13 = vsel %vm31_vm0, %v44_v12, 0.0 }
  0x98   :  { %49 = vadd.xlane.f32.xlu1 %v48_v13 }
 0x11d   :  { %v47_v18 = vpop.xlane.xlu1 %46 }
 0x11e   :  { %v51_v19 = vmul.f32 0.03125, %v47_v18 }
 0x120   :  { %v53_v20 = vadd.f32 1e-05, %v51_v19 }
 0x121   :  { %v50_v21 = vpop.xlane.xlu1 %49 }
 0x122   :  { %385 = vrsqrt.f32 %v53_v20  ;;  %v52_v22 = vmul.f32 0.03125, %v50_v21 }
 0x124   :  { %v54_v23 = vadd.f32 1e-05, %v52_v22 }
 0x126   :  { %387 = vrsqrt.f32 %v54_v23 }
 0x12f   :  { %v386_v24 = vpop.eup %385 }
 0x130   :  { %v57_v26 = vmul.f32 %v386_v24, %v41_v6 }
 0x132   :  { %v66_v27 = vmul.f32 %v310_v25, %v57_v26 }
 0x133   :  { %v388_v28 = vpop.eup %387 }
 0x134   :  { %v327_v29 = vpack.c.bf16 %v66_v27, %v66_v27  ;;  %v58_v30 = vmul.f32 %v388_v28, %v42_v10 }
 0x136   :  { %77 = vst.msk [vmem:[#allocation2] sm:$0xf] %vm76_vm2, %v327_v29  ;;  %v67_v31 = vmul.f32 %v310_v25, %v58_v30 }
 0x138   :  { %v328_v32 = vpack.c.bf16 %v67_v31, %v67_v31 }
 0x13a   :  { %78 = vst.msk [vmem:[#allocation2 + $0x4] sm:$0xf] %vm76_vm2, %v328_v32 }
 0x141   :  { %v376_v33 = vld [vmem:[#allocation2] sm:$0xff]  }
 0x142   :  { %346 = vmatmul.mubr.msk.bf16.vlgmr.msra.gmra.mxu0 %vm31_vm0, %v376_v33 }
 0x202   :  { %v149_v42 = vpop.f32.mrf.mxu0 }
 0x203   :  { %v150_v43 = vadd.f32 %v313_v41, %v149_v42 }
 0x204   :  { %v347_v44 = vpop.f32.mrf.mxu0 }
 0x205   :  { %v158_v45 = vmul.f32 0.70710677, %v150_v43  ;;  %v156_v53 = vmul.f32 0.5, %v150_v43 }
 0x206   :  { %v152_v46 = vpop.f32.mrf.mxu0 }
 0x207   :  { %389 = verf.f32 %v158_v45  ;;  %v153_v47 = vadd.f32 %v313_v41, %v152_v46 }
 0x208   :  { %v348_v48 = vpop.f32.mrf.mxu0 }
 0x209   :  { %v159_v49 = vmul.f32 0.70710677, %v153_v47  ;;  %v157_v54 = vmul.f32 0.5, %v153_v47 }
 0x20b   :  { %391 = verf.f32 %v159_v49 }
 0x214   :  { %v390_v50 = vpop.eup %389 }
 0x215   :  { %v162_v51 = vadd.f32 1.0, %v390_v50 }
 0x217   :  { %v164_v56 = vmul.f32 %v162_v51, %v156_v53 }
 0x218   :  { %v392_v52 = vpop.eup %391 }
 0x219   :  { %v163_v55 = vadd.f32 1.0, %v392_v52 }
 0x21b   :  { %v165_v57 = vmul.f32 %v163_v55, %v157_v54 }
 0x21d   :  { %v168_v58 = vpack.c.bf16 %v165_v57, %v164_v56 }
 0x21f   :  { %366 = vmatmul.mubr.bf16.vlgmr.msra.gmra.mxu1 %v168_v58 }
 0x2df   :  { %v267_v60 = vpop.f32.mrf.mxu1 }
 0x2e0   :  { %v274_v61 = vadd.f32 %v267_v60, %v166_v59 }
 0x2e1   :  { %v367_v62 = vpop.f32.mrf.mxu1 }
 0x2e2   :  { %276 = vst.msk [vmem:[#allocation3] sm:$0xff] %vm31_vm0, %v274_v61 }
 0x2e3   :  { %v270_v0 = vpop.f32.mrf.mxu1 }
 0x2e4   :  { %v275_v1 = vadd.f32 %v270_v0, %v167_v63 }
 0x2e5   :  { %v368_v2 = vpop.f32.mrf.mxu1 }
 0x2e6   :  { %277 = vst.msk [vmem:[#allocation3 + $0x8] sm:$0xff] %vm31_vm0, %v275_v1 }
 0x2e9   :  { %v281_v4 = vld [vmem:[#allocation3] sm:$0xff] }
 0x2ea   :  { %v290_v5 = vadd.f32 %v326_v3, %v281_v4 }
 0x2ec   :  { %292 = vst.msk [vmem:[#allocation3] sm:$0xff] %vm31_vm0, %v290_v5 }
 0x2ed   :  { %v282_v6 = vld [vmem:[#allocation3 + $0x8] sm:$0xff] }
 0x2ee   :  { %v291_v7 = vadd.f32 %v326_v3, %v282_v6 }
 0x2f0   :  { %293 = vst.msk [vmem:[#allocation3 + $0x8] sm:$0xff] %vm31_vm0, %v291_v7 }
 0x2f1   :  { %404 = shalt.err (!%p401_p4)
}
 0x2f2   :  { %s418_s0 = smov 128   ;;  %s419_s5 = smov 8  }
 0x2f3   :  { %305 = dma.vmem_to_hbm [thread:$0]  %s300_s23, 256, %s520_s6, [#allocation4], %s418_s0, %s418_s0, %s419_s5  }
 0x2f4   :  { %413 = dma.done.wait [#allocation4], 256  }
 0x2f5   :  { %414 = vsyncadd [#allocation4], 4294967040 }
 0x2f6   :  { %309 = vsyncpa [#allocation4], 1 }

</bundles_post_ra>
